<compile_context>
chip_gen: v6e
topology: v6e:2x2x1
jax: 0.10.0
libtpu: 0.0.40
codegen_flags: <defaults>
</compile_context>

<pallas_src>
import jax
import jax.numpy as jnp
from jax.experimental import pallas as pl
from jax.experimental.pallas import tpu as pltpu


def _round_up(n, m):
    return (n + m - 1) // m * m


def encoder_mnist_kernel(x_ref, w1_ref, w2_ref, b_ref, o_ref):
    # x_ref : (BM, F)     w1_ref : (F, Hp)    w2_ref : (Hp, Lp)
    # b_ref : (2, NP) f32 o_ref  : (BM, Lp)   (Hp, Lp multiples of 128)
    hp = w1_ref.shape[1]
    lp = w2_ref.shape[1]
    b = b_ref[...]                               # (2, NP), f32

    # fc_1 + ReLU: MXU matmul with f32 accumulation; bias/ReLU on the VPU.
    h = jnp.dot(x_ref[...], w1_ref[...], preferred_element_type=jnp.float32)
    h = jnp.maximum(h + b[0:1, :hp], 0.0)

    # fc_2 + ReLU.
    z = jnp.dot(h.astype(w2_ref.dtype), w2_ref[...],
                preferred_element_type=jnp.float32)
    o_ref[...] = jnp.maximum(z + b[1:2, :lp], 0.0).astype(o_ref.dtype)


def prepare_params(w1, b1, w2, b2, compute_dtype=jnp.bfloat16):
    """One-time layout prep (hoisted out of the forward path).

    PyTorch layout in:  w1 (H, F), b1 (H,), w2 (L, H), b2 (L,).
    Returns kernel-ready (in, out) weights with H and L zero-padded to
    multiples of 128 (lane-dense), plus both biases packed into one (2, NP)
    f32 array.
    """
    H, F = w1.shape
    L = w2.shape[0]
    Hp = _round_up(H, 128)
    Lp = _round_up(L, 128)
    NP = max(Hp, Lp)

    w1_t = jnp.zeros((F, Hp), compute_dtype).at[:, :H].set(
        jnp.transpose(w1).astype(compute_dtype))
    w2_t = jnp.zeros((Hp, Lp), compute_dtype).at[:H, :L].set(
        jnp.transpose(w2).astype(compute_dtype))
    biases = jnp.zeros((2, NP), jnp.float32)
    biases = biases.at[0, :H].set(b1.astype(jnp.float32))
    biases = biases.at[1, :L].set(b2.astype(jnp.float32))
    return w1_t, w2_t, biases, L


def _choose_block_m(B, block_m):
    """Pick the batch tile: as large as requested, but (a) never (much) larger
    than the 8-rounded batch and (b) with >= 2 grid blocks when B allows it so
    the "parallel" batch axis shards across v7x's 2 TensorCores."""
    bm = min(block_m, _round_up(B, 8))
    if B > 8 and pl.cdiv(B, bm) < 2:
        bm = _round_up(pl.cdiv(B, 2), 8)
    return max(bm, 8)


def encoder_mnist(x, w1_t, w2_t, biases, d_latent, *, block_m=512,
                  out_dtype=None, slice_latent=True):
    """x: (B, F). Returns (B, d_latent) (or the lane-dense (B, Lp) slab if
    slice_latent=False, so a consumer can fuse the column slice)."""
    B, F = x.shape
    Hp = w1_t.shape[1]
    Lp = w2_t.shape[1]
    if out_dtype is None:
        out_dtype = x.dtype

    bm = _choose_block_m(B, block_m)
    nb = pl.cdiv(B, bm)

    # Feed x in the weight dtype (bf16 by default -> half the HBM traffic for
    # the dominant stream). Ideally the caller already supplies bf16 x.
    if x.dtype != w1_t.dtype:
        x = x.astype(w1_t.dtype)

    out = pl.pallas_call(
        encoder_mnist_kernel,
        out_shape=jax.ShapeDtypeStruct((B, Lp), out_dtype),
        grid=(nb,),
        in_specs=[
            pl.BlockSpec((bm, F), lambda i: (i, 0)),    # x: tiled over batch
            pl.BlockSpec((F, Hp), lambda i: (0, 0)),    # W1: batch-invariant
            pl.BlockSpec((Hp, Lp), lambda i: (0, 0)),   # W2: batch-invariant
            pl.BlockSpec(biases.shape, lambda i: (0, 0)),   # packed biases
        ],
        out_specs=pl.BlockSpec((bm, Lp), lambda i: (i, 0)),
        compiler_params=pltpu.CompilerParams(
            dimension_semantics=("parallel",)),
        # If a trace still shows exposed x-tile DMA at block boundaries, add
        # pipeline_mode=pl.Buffered(3) on the x BlockSpec above.
    )(x, w1_t, w2_t, biases)

    if slice_latent:
        return out[:, :d_latent]
    return out


def reference(x, w1, b1, w2, b2):
    h = jnp.maximum(x @ w1.T + b1, 0.0)
    return jnp.maximum(h @ w2.T + b2, 0.0)


if __name__ == "__main__":
    # Module hyper-params: in_features=256 -> hidden=128 -> d_latent=64.
    IN_FEATURES, D_LATENT = 256, 64
    HIDDEN = IN_FEATURES // 2
    B = 200  # non-block-aligned -> exercises the ragged-last-block path

    key = jax.random.PRNGKey(0)
    kx, k1, k2, k3, k4 = jax.random.split(key, 5)

    x = jax.random.normal(kx, (B, IN_FEATURES), dtype=jnp.float32)
    # PyTorch nn.Linear parameter shapes: (out, in) weights, (out,) biases.
    w1 = jax.random.uniform(k1, (HIDDEN, IN_FEATURES), jnp.float32, -0.06, 0.06)
    b1 = jax.random.uniform(k2, (HIDDEN,),             jnp.float32, -0.06, 0.06)
    w2 = jax.random.uniform(k3, (D_LATENT, HIDDEN),    jnp.float32, -0.09, 0.09)
    b2 = jax.random.uniform(k4, (D_LATENT,),           jnp.float32, -0.09, 0.09)

    ref = reference(x, w1, b1, w2, b2)

    # --- bf16 compute path (recommended config), f32 output for comparison ---
    w1_bf, w2_bf, biases_bf, L = prepare_params(w1, b1, w2, b2,
                                                compute_dtype=jnp.bfloat16)
    x_bf = x.astype(jnp.bfloat16)  # caller-side one-time cast ("feed x as bf16")
    out_bf = encoder_mnist(x_bf, w1_bf, w2_bf, biases_bf, L,
                           out_dtype=jnp.float32)
    jax.block_until_ready(out_bf)
    assert out_bf.shape == (B, D_LATENT)
    assert jnp.allclose(out_bf, ref, atol=2e-2, rtol=2e-2)

    # Ragged tiny batch (block larger than remaining rows; masked store path).
    out_small = encoder_mnist(x_bf[:10], w1_bf, w2_bf, biases_bf, L,
                              out_dtype=jnp.float32)
    jax.block_until_ready(out_small)
    assert out_small.shape == (10, D_LATENT)
    assert jnp.allclose(out_small, ref[:10], atol=2e-2, rtol=2e-2)

    # Lane-dense slab output (column slice deferred to the consumer).
    slab = encoder_mnist(x_bf, w1_bf, w2_bf, biases_bf, L,
                         out_dtype=jnp.float32, slice_latent=False)
    jax.block_until_ready(slab)
    assert slab.shape[0] == B and slab.shape[1] % 128 == 0
    assert jnp.allclose(slab[:, :D_LATENT], ref, atol=2e-2, rtol=2e-2)

    # --- f32 compute path: exact-semantics check at tight tolerance ---
    w1_f, w2_f, biases_f, _ = prepare_params(w1, b1, w2, b2,
                                             compute_dtype=jnp.float32)
    out_f32 = encoder_mnist(x[:64], w1_f, w2_f, biases_f, L)
    jax.block_until_ready(out_f32)
    assert out_f32.shape == (64, D_LATENT)
    assert jnp.allclose(out_f32, ref[:64], atol=1e-5, rtol=1e-5)

    print("KERNEL_OK")
</pallas_src>

<mosaic_0001>
module attributes {stable_mosaic.version = 11 : i64} {
  func.func @encoder_mnist_kernel(%arg0: i32, %arg1: memref<104x256xbf16, #tpu.memory_space<vmem>>, %arg2: memref<256x128xbf16, #tpu.memory_space<vmem>>, %arg3: memref<128x128xbf16, #tpu.memory_space<vmem>>, %arg4: memref<2x128xf32, #tpu.memory_space<vmem>>, %arg5: memref<104x128xf32, #tpu.memory_space<vmem>>) attributes {dimension_semantics = [#tpu.dimension_semantics<parallel>], iteration_bounds = array<i64: 2>, scalar_prefetch = 0 : i64, scratch_operands = 0 : i64, tpu.core_type = #tpu.core_type<tc>, window_params = [{transform_indices = @transform_0, window_bounds = array<i64: 104, 256>}, {pipeline_mode = #tpu.pipeline_mode<synchronous>, transform_indices = @transform_1, window_bounds = array<i64: 256, 128>}, {pipeline_mode = #tpu.pipeline_mode<synchronous>, transform_indices = @transform_2, window_bounds = array<i64: 128, 128>}, {pipeline_mode = #tpu.pipeline_mode<synchronous>, transform_indices = @transform_3, window_bounds = array<i64: 2, 128>}, {transform_indices = @transform_4, window_bounds = array<i64: 104, 128>}]} {
    %c0 = arith.constant 0 : index
    %c0_0 = arith.constant 0 : index
    %0 = vector.load %arg4[%c0, %c0_0] : memref<2x128xf32, #tpu.memory_space<vmem>>, vector<2x128xf32>
    %c0_1 = arith.constant 0 : index
    %c0_2 = arith.constant 0 : index
    %1 = vector.load %arg1[%c0_1, %c0_2] : memref<104x256xbf16, #tpu.memory_space<vmem>>, vector<104x256xbf16>
    %c0_3 = arith.constant 0 : index
    %c0_4 = arith.constant 0 : index
    %2 = vector.load %arg2[%c0_3, %c0_4] : memref<256x128xbf16, #tpu.memory_space<vmem>>, vector<256x128xbf16>
    %cst = arith.constant dense<0.000000e+00> : vector<104x128xf32>
    %3 = tpu.matmul %1, %2, %cst {dimension_numbers = #tpu.dot_dimension_numbers<[1], [0], [0], [1], [0, 0, 1, 1], [], []>} : vector<104x256xbf16>, vector<256x128xbf16>, vector<104x128xf32> -> vector<104x128xf32>
    %4 = vector.extract_strided_slice %0 {offsets = [0, 0], sizes = [1, 128], strides = [1, 1]} : vector<2x128xf32> to vector<1x128xf32>
    %5 = vector.broadcast %4 : vector<1x128xf32> to vector<104x128xf32>
    %6 = arith.addf %3, %5 : vector<104x128xf32>
    %cst_5 = arith.constant 0.000000e+00 : f32
    %7 = vector.broadcast %cst_5 : f32 to vector<104x128xf32>
    %8 = arith.maximumf %6, %7 : vector<104x128xf32>
    %9 = arith.truncf %8 : vector<104x128xf32> to vector<104x128xbf16>
    %c0_6 = arith.constant 0 : index
    %c0_7 = arith.constant 0 : index
    %10 = vector.load %arg3[%c0_6, %c0_7] : memref<128x128xbf16, #tpu.memory_space<vmem>>, vector<128x128xbf16>
    %cst_8 = arith.constant dense<0.000000e+00> : vector<104x128xf32>
    %11 = tpu.matmul %9, %10, %cst_8 {dimension_numbers = #tpu.dot_dimension_numbers<[1], [0], [0], [1], [0, 0, 1, 1], [], []>} : vector<104x128xbf16>, vector<128x128xbf16>, vector<104x128xf32> -> vector<104x128xf32>
    %12 = vector.extract_strided_slice %0 {offsets = [1, 0], sizes = [1, 128], strides = [1, 1]} : vector<2x128xf32> to vector<1x128xf32>
    %13 = vector.broadcast %12 : vector<1x128xf32> to vector<104x128xf32>
    %14 = arith.addf %11, %13 : vector<104x128xf32>
    %cst_9 = arith.constant 0.000000e+00 : f32
    %15 = vector.broadcast %cst_9 : f32 to vector<104x128xf32>
    %16 = arith.maximumf %14, %15 : vector<104x128xf32>
    %c0_10 = arith.constant 0 : index
    %c0_11 = arith.constant 0 : index
    %17 = vector.load %arg5[%c0_10, %c0_11] : memref<104x128xf32, #tpu.memory_space<vmem>>, vector<104x128xf32>
    tpu.vector_store %arg5[%c0_10, %c0_11], %16 {strides = array<i32>} : memref<104x128xf32, #tpu.memory_space<vmem>>, vector<104x128xf32>,
    return
  }
  func.func @transform_0(%arg0: i32) -> (i32, i32) {
    %c0_i32 = arith.constant 0 : i32
    %c0_i32_0 = arith.constant 0 : i32
    return %arg0, %c0_i32 : i32, i32
  }
  func.func @transform_1(%arg0: i32) -> (i32, i32) {
    %c0_i32 = arith.constant 0 : i32
    %c0_i32_0 = arith.constant 0 : i32
    %c0_i32_1 = arith.constant 0 : i32
    return %c0_i32, %c0_i32_0 : i32, i32
  }
  func.func @transform_2(%arg0: i32) -> (i32, i32) {
    %c0_i32 = arith.constant 0 : i32
    %c0_i32_0 = arith.constant 0 : i32
    %c0_i32_1 = arith.constant 0 : i32
    return %c0_i32, %c0_i32_0 : i32, i32
  }
  func.func @transform_3(%arg0: i32) -> (i32, i32) {
    %c0_i32 = arith.constant 0 : i32
    %c0_i32_0 = arith.constant 0 : i32
    %c0_i32_1 = arith.constant 0 : i32
    return %c0_i32, %c0_i32_0 : i32, i32
  }
  func.func @transform_4(%arg0: i32) -> (i32, i32) {
    %c0_i32 = arith.constant 0 : i32
    %c0_i32_0 = arith.constant 0 : i32
    return %arg0, %c0_i32 : i32, i32
  }
}

</mosaic_0001>

<bundles_post_ra>
// kernel: tpu_custom_call.1
= control target key start
LH: loop header
LB: loop body
LE: loop exit
PB: predicated region body
PF: predicated region fallthrough
CT: control target
= control target key end

     0   :  { %9 = vsyncpa [#allocation3], 0  ;;  %s1663_s0 = inlined_call_operand.hbm [shape: bf16[200,256], index: 0, kind: input, shape index: {}]   ;;  %s1664_s1 = inlined_call_operand.hbm [shape: bf16[256,128], index: 1, kind: input, shape index: {}]   ;;  %s1665_s2 = inlined_call_operand.hbm [shape: bf16[128,128], index: 2, kind: input, shape index: {}]   ;;  %s1666_s3 = inlined_call_operand.vmem [shape: f32[2,128], index: 3, kind: input, shape index: {}]   ;;  %s1667_s4 = inlined_call_operand.hbm [shape: f32[200,128], index: 4, kind: output, shape index: {}]  }
   0x1   :  { %11 = vsyncpa [#allocation3 + $0x1], 0 }
   0x2   :  { %12 = vsyncpa [#allocation6], 0 }
   0x3   :  { %13 = vsyncpa [#allocation4], 0 }
   0x4   :  { %15 = vsyncpa [#allocation4 + $0x1], 0  ;;  %s1361_s15 = smov 0   ;;  %s1363_s16 = smov 0  }
   0x5   :  { %s1365_s17 = smov 0   ;;  %s1367_s18 = smov 0  }
   0x6 LB: > { %s1382_s19 = sadd.s32 4294967295, %s1322_s18   ;;  %s880_s20 = sadd.s32 4294967294, %s1322_s18   ;;  %s1322_s18 = sphi %s1367_s18, %s1684_s18   ;;  %s1318_s17 = sphi %s1365_s17, %s1683_s17   ;;  %s1314_s16 = sphi %s1363_s16, %s1682_s16   ;;  %s1310_s15 = sphi %s1361_s15, %s1681_s15  }
   0x7   : > { %s1386_s21 = sadd.s32 1, %s1322_s18   ;;  %s28_s22 = sadd.s32 1, %s1318_s17 }
   0x8   : > { %s25_s23 = ssub.s32 %s1322_s18, %s1386_s21  ;;  %p35_p0 = scmp.ne.s32.totalorder %s1318_s17, %s1314_s16 }
   0x9   : > { %p26_p1 = scmp.eq.s32.totalorder %s25_s23, 0  ;;  %p36_p2 = scmp.eq.s32.totalorder %s1322_s18, 0 }
   0xa   : > { %p41_p3 = scmp.ne.s32.totalorder %s1314_s16, %s1310_s15  ;;  %p1668_p4 = scmp.eq.s32.totalorder %s1382_s19, 0 }
   0xb   : > { %s1398_s24 = scalar_select %p26_p1, %s1318_s17, %s28_s22  }
   0xc   : > { %p1400_p5 = por %p36_p2, %p35_p0  ;;  %p1406_p6 = por %p1668_p4, %p41_p3 }
   0xd   : > { %p128_p7 = scmp.eq.s32.totalorder %s1382_s19, 1  ;;  %p134_p8 = scmp.eq.s32.totalorder %s880_s20, 1 }
   0xe   : > { %s1671_s26 = scalar_select %p1406_p6, 1, 0 }
   0xf   : > { %p881_p9 = scmp.ge.s32.totalorder %s1322_s18, 1  ;;  %p141_p10 = scmp.lt.s32.totalorder %s1322_s18, 3 }
  0x10   : > { %p1413_p11 = por %p128_p7, %p35_p0  ;;  %p1417_p12 = por %p134_p8, %p41_p3 }
  0x11   : > { %p1421_p13 = pnand %p881_p9, %p141_p10  ;;  %s1324_s30 = smov [#allocation5]  }
  0x12   : > { %s1672_s27 = scalar_select %p1413_p11, 1, 0 }
  0x13   : > { %s1673_s28 = scalar_select %p1417_p12, 1, 0 }
  0x14   : > { %p1074_p1 = pneg %p1421_p13  ;;  %s153_s5 = sshll.u32 %s1324_s30, 4  ;;  %s154_s5 = int_to_ptr.vmem [resolvable:$true] %s153_s5 }
  0x15   : > { %s1325_s7 = smov [#allocation7]   ;;  %s1187_s9 = scalar_lea.vmem %s154_s5, 2048 }
  0x16   : > { %p1429_p2 = pnand %p1074_p1, %p1668_p4  ;;  %s166_s8 = sshll.u32 %s1325_s7, 4  ;;  %s167_s8 = int_to_ptr.vmem [resolvable:$true] %s166_s8 }
  0x17   : > { %p1188_p3 = scmp.ne.s32.totalorder %s154_s5, %s1187_s9  ;;  %p1195_p9 = scmp.lt.s32.totalorder %s154_s5, %s154_s5 }
  0x18   : > { %p1178_p0 = pneg %p1429_p2  ;;  %p1196_p10 = scmp.lt.s32.totalorder %s1187_s9, %s1187_s9 }
  0x1a   : > { %p1190_p7 = pnand %p1188_p3, %p1178_p0  ;;  %p1197_p12 = por %p1196_p10, %p1195_p9 }
  0x1c   : > { %p1191_p8 = pneg %p1190_p7 }
  0x1e   : > { %p1198_p1 = pnand %p1197_p12, %p1191_p8 }
  0x20   : > { %1201 = shalt.err (!%p1198_p1)
}
  0x21   : > { %s1326_s10 = smov 64   ;;  %s1327_s11 = smov 4  }
  0x22   : > { %1077 = dma.hbm_to_vmem [thread:$0]  (!%p1429_p2), %s1664_s1, 2048, %s154_s5, [#allocation6], %s1326_s10, %s1326_s10, %s1327_s11  }
  0x23   : > { %s1213_s14 = scalar_lea.vmem %s167_s8, 1024  ;;  %p1221_p11 = scmp.lt.s32.totalorder %s167_s8, %s167_s8 }
  0x24   : > { %p1214_p4 = scmp.ne.s32.totalorder %s167_s8, %s1213_s14  ;;  %p1222_p6 = scmp.lt.s32.totalorder %s1213_s14, %s1213_s14 }
  0x26   : > { %p1216_p3 = pnand %p1214_p4, %p1178_p0  ;;  %p1223_p9 = por %p1222_p6, %p1221_p11 }
  0x28   : > { %p1217_p7 = pneg %p1216_p3 }
  0x2a   : > { %p1224_p12 = pnand %p1223_p9, %p1217_p7 }
  0x2c   : > { %1227 = shalt.err (!%p1224_p12)
}
  0x2d   : > { %1080 = dma.hbm_to_vmem [thread:$0]  (!%p1429_p2), %s1665_s2, 1024, %s167_s8, [#allocation6], %s1326_s10, %s1326_s10, %s1327_s11  }
  0x2e   : > { %p884_p8 = scmp.ge.s32.totalorder %s1322_s18, 2 }
  0x30   : > { %179 = sbr.rel (%p884_p8) target bundleno = 87 (0x57), region = 28 }
  0x35   : > { %182 = sbr.rel (!%p1400_p5) target bundleno = 87 (0x57), region = 32  ;;  %s183_s23 = sand.u32 (%p1400_p5), 1, %s1318_s17  }
  0x36   : > { %s188_s30 = smul.u32 (%p1400_p5), 13, %s1322_s18  ;;  %s1461_s9 = scalar_lea.sflag (%p1400_p5), [#allocation3], %s183_s23 }
  0x37   : > { %s1062_s5 = smul.u32 (%p1400_p5), 104, %s183_s23 }
  0x38   : > { %s189_s7 = ssub.s32 (%p1400_p5), 25, %s188_s30 }
  0x39   : > { %p190_p4 = scmp.lt.s32.totalorder (%p1400_p5), %s189_s7, 13  ;;  %s187_s10 = scalar_lea.vmem (%p1400_p5), [#allocation2], %s1062_s5 }
  0x3b   : > { %s1686_s7 = smov (!%p190_p4, %s189_s7), 13 }
  0x3c   : > { %s1458_s6 = sshll.u32 %s1686_s7, 7 }
  0x3d   : > { %s195_s8 = ssub.s32 1664, %s1458_s6 }
  0x3e   : > { %196 = vsyncadd %s1461_s9, %s195_s8  ;;  %p887_p5 = scmp.ne.s32.totalorder %s1458_s6, 0  ;;  %s944_s25 = smul.u32 1664, %s1322_s18 }
  0x3f   : > { %s202_s11 = sshll.u32 %s187_s10, 4  ;;  %s1232_s30 = scalar_lea.hbm %s1663_s0, 3200  ;;  %s1471_s11 = int_to_ptr.vmem [resolvable:$true] %s202_s11 }
  0x40   : > { %s1469_s14 = scalar_lea.hbm %s1663_s0, %s944_s25 }
  0x41   : > { %s1228_s20 = scalar_lea.hbm %s1469_s14, %s1458_s6  ;;  %p1233_p0 = scmp.lt.s32.totalorder %s1469_s14, %s1663_s0 }
  0x42   : > { %p1229_p6 = scmp.ne.s32.totalorder %s1469_s14, %s1228_s20  ;;  %p1234_p10 = scmp.lt.s32.totalorder %s1232_s30, %s1228_s20 }
  0x44   : > { %p1230_p11 = pnand %p1229_p6, %p887_p5  ;;  %p1235_p1 = por %p1234_p10, %p1233_p0 }
  0x46   : > { %p1231_p2 = pneg %p1230_p11 }
  0x48   : > { %p1236_p3 = pnand %p1235_p1, %p1231_p2 }
  0x4a   : > { %1239 = shalt.err (!%p1236_p3)
}
  0x4b   : > { %s1240_s8 = scalar_lea.vmem %s1471_s11, %s1458_s6  ;;  %s1328_s10 = smov [#allocation2]  }
  0x4c   : > { %p1241_p7 = scmp.ne.s32.totalorder %s1471_s11, %s1240_s8  ;;  %s1244_s25 = sshll.u32 %s1328_s10, 4  ;;  %s1245_s25 = int_to_ptr.vmem [resolvable:$false] %s1244_s25 }
  0x4d   : > { %s1246_s12 = scalar_lea.vmem %s1245_s25, 3328  ;;  %p1247_p4 = scmp.lt.s32.totalorder %s1471_s11, %s1245_s25 }
  0x4e   : > { %p1242_p9 = pnand %p1241_p7, %p887_p5  ;;  %p1248_p6 = scmp.lt.s32.totalorder %s1246_s12, %s1240_s8 }
  0x50   : > { %p1243_p12 = pneg %p1242_p9  ;;  %p1249_p11 = por %p1248_p6, %p1247_p4 }
  0x52   : > { %p1250_p0 = pnand %p1249_p11, %p1243_p12 }
  0x54   : > { %1253 = shalt.err (!%p1250_p0)
}
  0x55   : > { %s1329_s13 = smov 128   ;;  %s1330_s20 = smov 8  }
  0x56   : > { %208 = dma.hbm_to_vmem [thread:$0]  (%p887_p5), %s1469_s14, %s1458_s6, %s1471_s11, %s1461_s9, %s1329_s13, %s1329_s13, %s1330_s20  }
  0x57 PF: > { %214 = sbr.rel (%p1421_p13) target bundleno = 610 (0x262), region = 36  ;;  %s1500_s22 = sand.u32 (!%p1421_p13), 1, %s1314_s16  }
  0x58   : > { %s1063_s23 = smul.u32 (!%p1421_p13), 104, %s1500_s22  ;;  %s217_s30 = scalar_lea.sflag (!%p1421_p13), [#allocation3], %s1500_s22 }
  0x59   : > { %p1676_p2 = scmp.ne.s32.totalorder (!%p1421_p13), %s1671_s26, 0 }
  0x5a   : > { %s1506_s5 = scalar_lea.vmem (!%p1421_p13), [#allocation2], %s1063_s23 }
  0x5c   : > { %1297 = dma.done.wait (%p1676_p2), %s217_s30, 1664  }
  0x5d   : > { %1299 = vsyncadd (%p1676_p2), %s217_s30, 4294965632  ;;  %p1677_p5 = scmp.eq.s32.totalorder %s1382_s19, 0 }
  0x5f   : > { %1301 = dma.done.wait (%p1677_p5), [#allocation6], 3072   ;;  %p1678_p13 = pmov %p1677_p5 }
  0x60   : > { %v1331_v0 = vmov 0.0   ;;  %v1132_v1 = vld [vmem:[#allocation5 + $0x78] sm:$0xff]   ;;  %v1134_v3 = vld [vmem:[#allocation5 + $0x70] sm:$0xff]   ;;  %v1136_v5 = vld [vmem:[#allocation5 + $0x68] sm:$0xff]   ;;  %vm1332_vm0 = vmmov 0   ;;  %v311_v40 = vlaneseq  ;;  %s1574_s6 = scalar_lea.vmem [#allocation8], %s1063_s23 }
  0x61   : > { %1303 = vsyncadd (%p1678_p13), [#allocation6], 4294964224  ;;  %1018 = vmatprep.subr.bf16.mxu1 %v1331_v0  ;;  %v1133_v2 = vld [vmem:[#allocation5 + $0x38] sm:$0xff]   ;;  %945 = vmatprep.subr.bf16.mxu0 %v1132_v1  ;;  %v1135_v4 = vld [vmem:[#allocation5 + $0x30] sm:$0xff]   ;;  %s769_s9 = scalar_lea.sflag [#allocation4], %s1500_s22  ;;  %p1679_p10 = scmp.ne.s32.totalorder %s1672_s27, 0 }
  0x62   : > { %946 = vmatpush3.bf16.msra.mxu0 %v1133_v2  ;;  %v1137_v6 = vld [vmem:[#allocation5 + $0x28] sm:$0xff]   ;;  %v1138_v7 = vld [vmem:[#allocation5 + $0x60] sm:$0xff]   ;;  %v1140_v9 = vld [vmem:[#allocation5 + $0x58] sm:$0xff]   ;;  %1034 = vmatprep.mubr.msk.bf16.mxu1 %vm1332_vm0, %v1331_v0  ;;  %v312_v41 = vshrl.u32 %v311_v40, 7  ;;  %s776_s11 = smul.u32 (%p1679_p10), 13, %s1382_s19 }
  0x63   : > { %947 = vmatprep.subr.bf16.mxu0 %v1134_v3  ;;  %v1139_v8 = vld [vmem:[#allocation5 + $0x20] sm:$0xff]   ;;  %v1141_v10 = vld [vmem:[#allocation5 + $0x18] sm:$0xff]   ;;  %v1142_v11 = vld [vmem:[#allocation5 + $0x50] sm:$0xff]  }
  0x64   : > { %v1150_v12 = vld [vmem:[%s1506_s5 + $0x4] ss:$8 sps:$4 sm:$0xff]   ;;  %v1144_v14 = vld [vmem:[#allocation5 + $0x48] sm:$0xff]   ;;  %v1148_v20 = vld [vmem:[%s1506_s5] ss:$8 sps:$4 sm:$0xff]   ;;  %v604_v42 = vsub.s32 1, %v312_v41 }
  0x65   : > { %v1143_v13 = vld [vmem:[#allocation5 + $0x10] sm:$0xff]   ;;  %510 = vmatprep.mubr.bf16.mxu0 %v1150_v12  ;;  %v1145_v15 = vld [vmem:[#allocation5 + $0x8] sm:$0xff]   ;;  %v1146_v16 = vld [vmem:[#allocation5 + $0x40] sm:$0xff]   ;;  %v313_v45 = vsub.s32 0, %v312_v41  ;;  %s777_s14 = ssub.s32 (%p1679_p10), 25, %s776_s11 }
  0x66   : > { %948 = vmatpush3.bf16.msra.mxu0 %v1135_v4  ;;  %v1168_v17 = vld [vmem:[#allocation7 + $0x38] sm:$0xff]   ;;  %v1147_v18 = vld [vmem:[#allocation5] sm:$0xff]   ;;  %v1169_v19 = vld [vmem:[#allocation7 + $0x30] sm:$0xff]   ;;  %p778_p1 = scmp.lt.s32.totalorder (%p1679_p10), %s777_s14, 13 }
  0x67   : > { %949 = vmatprep.subr.bf16.mxu0 %v1136_v5  ;;  %1019 = vmatpush3.bf16.msra.mxu1 %v1168_v17  ;;  %v1151_v21 = vld [vmem:[%s1506_s5 + $0x14] ss:$8 sps:$4 sm:$0xff]   ;;  %v1153_v24 = vld [vmem:[%s1506_s5 + $0x10] ss:$8 sps:$4 sm:$0xff]   ;;  %v1154_v25 = vld [vmem:[%s1506_s5 + $0x24] ss:$8 sps:$4 sm:$0xff]  }
  0x68   : > { %1020 = vmatprep.subr.bf16.mxu1 %v1331_v0  ;;  %v1170_v22 = vld [vmem:[#allocation7 + $0x28] sm:$0xff]   ;;  %v1171_v23 = vld [vmem:[#allocation7 + $0x20] sm:$0xff]   ;;  %v278_v32 = vld [vmem:[%s1506_s5 + $0x60] sm:$0xff] }
  0x69   : > { %v1156_v26 = vld [vmem:[%s1506_s5 + $0x20] ss:$8 sps:$4 sm:$0xff]   ;;  %v1157_v27 = vld [vmem:[%s1506_s5 + $0x34] ss:$8 sps:$4 sm:$0xff]   ;;  %v1159_v28 = vld [vmem:[%s1506_s5 + $0x30] ss:$8 sps:$4 sm:$0xff]   ;;  %v908_v34 = vcombine.high %v278_v32, %v278_v32  ;;  %v907_v35 = vcombine.low %v278_v32, %v278_v32 }
  0x6a   : > { %950 = vmatpush3.bf16.msra.mxu0 %v1137_v6  ;;  %v1160_v29 = vld [vmem:[%s1506_s5 + $0x44] ss:$8 sps:$4 sm:$0xff]   ;;  %v1162_v30 = vld [vmem:[%s1506_s5 + $0x40] ss:$8 sps:$4 sm:$0xff]   ;;  %v1163_v31 = vld [vmem:[%s1506_s5 + $0x54] ss:$8 sps:$4 sm:$0xff]  }
  0x6b   : > { %951 = vmatprep.subr.bf16.mxu0 %v1138_v7  ;;  %1021 = vmatpush3.bf16.msra.mxu1 %v1169_v19  ;;  %v1165_v33 = vld [vmem:[%s1506_s5 + $0x50] ss:$8 sps:$4 sm:$0xff]   ;;  %v1172_v36 = vld [vmem:[#allocation7 + $0x18] sm:$0xff]  }
  0x6c   : > { %1022 = vmatprep.subr.bf16.mxu1 %v1331_v0  ;;  %v1173_v37 = vld [vmem:[#allocation7 + $0x10] sm:$0xff]   ;;  %v1174_v38 = vld [vmem:[#allocation7 + $0x8] sm:$0xff]   ;;  %v1175_v39 = vld [vmem:[#allocation7] sm:$0xff]  }
  0x6d   : > { %v265_v43 = vld [vmem:[%s1666_s3] sm:$0x3] }
  0x6e   : > { %952 = vmatpush3.bf16.msra.mxu0 %v1139_v8  ;;  %v1542_v44 = vrot.slane %v265_v43, %v604_v42  ;;  %v1544_v48 = vrot.slane %v265_v43, %v313_v45 }
  0x6f   : > { %953 = vmatprep.subr.bf16.mxu0 %v1140_v9  ;;  %1023 = vmatpush3.bf16.msra.mxu1 %v1170_v22 }
  0x70   : > { %1024 = vmatprep.subr.bf16.mxu1 %v1331_v0 }
  0x72   : > { %954 = vmatpush3.bf16.msra.mxu0 %v1141_v10 }
  0x73   : > { %955 = vmatprep.subr.bf16.mxu0 %v1142_v11  ;;  %1025 = vmatpush3.bf16.msra.mxu1 %v1171_v23 }
  0x74   : > { %1026 = vmatprep.subr.bf16.mxu1 %v1331_v0 }
  0x76   : > { %956 = vmatpush3.bf16.msra.mxu0 %v1143_v13 }
  0x77   : > { %957 = vmatprep.subr.bf16.mxu0 %v1144_v14  ;;  %1027 = vmatpush3.bf16.msra.mxu1 %v1172_v36 }
  0x78   : > { %1028 = vmatprep.subr.bf16.mxu1 %v1331_v0 }
  0x7a   : > { %958 = vmatpush3.bf16.msra.mxu0 %v1145_v15 }
  0x7b   : > { %959 = vmatprep.subr.bf16.mxu0 %v1146_v16  ;;  %1029 = vmatpush3.bf16.msra.mxu1 %v1173_v37 }
  0x7c   : > { %1030 = vmatprep.subr.bf16.mxu1 %v1331_v0 }
  0x7e   : > { %960 = vmatpush3.bf16.msra.mxu0 %v1147_v18 }
  0x7f   : > { %1031 = vmatpush3.bf16.msra.mxu1 %v1174_v38 }
  0x80   : > { %1032 = vmatprep.subr.bf16.mxu1 %v1331_v0 }
  0x81   : > { %511 = vmatmul.mubr.bf16.vlgmr.msra.gmra.mxu0 %v1148_v20 }
  0x82   : > { %518 = vmatprep.mubr.bf16.mxu0 %v1151_v21 }
  0x83   : > { %1033 = vmatpush3.bf16.msra.mxu1 %v1175_v39 }
  0x89   : > { %519 = vmatmul.mubr.bf16.gmra.mxu0 %v1153_v24 }
  0x8a   : > { %526 = vmatprep.mubr.bf16.mxu0 %v1154_v25 }
  0x91   : > { %527 = vmatmul.mubr.bf16.gmra.mxu0 %v1156_v26 }
  0x92   : > { %534 = vmatprep.mubr.bf16.mxu0 %v1157_v27 }
  0x99   : > { %535 = vmatmul.mubr.bf16.gmra.mxu0 %v1159_v28 }
  0x9a   : > { %542 = vmatprep.mubr.bf16.mxu0 %v1160_v29 }
  0xa1   : > { %543 = vmatmul.mubr.bf16.gmra.mxu0 %v1162_v30 }
  0xa2   : > { %550 = vmatprep.mubr.bf16.mxu0 %v1163_v31 }
  0xa9   : > { %551 = vmatmul.mubr.bf16.gmra.mxu0 %v1165_v33 }
  0xaa   : > { %558 = vmatprep.mubr.bf16.mxu0 %v908_v34 }
  0xb1   : > { %559 = vmatmul.mubr.bf16.gmra.mxu0 %v907_v35 }
 0x141   : > { %v961_v46 = vpop.f32.mrf.mxu0 }
 0x143   : > { %v962_v47 = vpop.f32.mrf.mxu0 }
 0x144   : > { %v963_v49 = vadd.f32 %v962_v47, %v961_v46 }
 0x145   : > { %v964_v50 = vpop.f32.mrf.mxu0 }
 0x146   : > { %v513_v52 = vadd.f32 %v963_v49, %v1544_v48 }
 0x147   : > { %v965_v51 = vpop.f32.mrf.mxu0 }
 0x148   : > { %v966_v53 = vadd.f32 %v965_v51, %v964_v50  ;;  %v566_v57 = vmax.f32 %v513_v52, 0.0 }
 0x149   : > { %v967_v54 = vpop.f32.mrf.mxu0 }
 0x14a   : > { %v516_v55 = vadd.f32 %v966_v53, %v1544_v48 }
 0x14b   : > { %v968_v56 = vpop.f32.mrf.mxu0 }
 0x14c   : > { %v567_v58 = vmax.f32 %v516_v55, 0.0  ;;  %v969_v59 = vadd.f32 %v968_v56, %v967_v54 }
 0x14d   : > { %v970_v60 = vpop.f32.mrf.mxu0 }
 0x14e   : > { %v579_v61 = vpack.c.bf16 %v567_v58, %v566_v57  ;;  %v521_v63 = vadd.f32 %v969_v59, %v1544_v48 }
 0x14f   : > { %v971_v62 = vpop.f32.mrf.mxu0 }
 0x150   : > { %v972_v1 = vadd.f32 %v971_v62, %v970_v60  ;;  %1035 = vmatmul.mubr.bf16.vlgmr.msra.gmra.mxu1 %v579_v61  ;;  %v568_v5 = vmax.f32 %v521_v63, 0.0 }
 0x151   : > { %v973_v2 = vpop.f32.mrf.mxu0  ;;  %1038 = vmatprep.mubr.msk.bf16.mxu1 %vm1332_vm0, %v1331_v0 }
 0x152   : > { %v524_v3 = vadd.f32 %v972_v1, %v1544_v48 }
 0x153   : > { %v974_v4 = vpop.f32.mrf.mxu0 }
 0x154   : > { %v569_v6 = vmax.f32 %v524_v3, 0.0  ;;  %v975_v7 = vadd.f32 %v974_v4, %v973_v2 }
 0x155   : > { %v976_v8 = vpop.f32.mrf.mxu0 }
 0x156   : > { %v580_v9 = vpack.c.bf16 %v569_v6, %v568_v5  ;;  %v529_v11 = vadd.f32 %v975_v7, %v1544_v48 }
 0x157   : > { %v977_v10 = vpop.f32.mrf.mxu0 }
 0x158   : > { %v978_v12 = vadd.f32 %v977_v10, %v976_v8  ;;  %1039 = vmatmul.mubr.bf16.gmra.mxu1 %v580_v9  ;;  %v570_v16 = vmax.f32 %v529_v11, 0.0 }
 0x159   : > { %v979_v13 = vpop.f32.mrf.mxu0  ;;  %1042 = vmatprep.mubr.msk.bf16.mxu1 %vm1332_vm0, %v1331_v0 }
 0x15a   : > { %v532_v14 = vadd.f32 %v978_v12, %v1544_v48 }
 0x15b   : > { %v980_v15 = vpop.f32.mrf.mxu0 }
 0x15c   : > { %v571_v17 = vmax.f32 %v532_v14, 0.0  ;;  %v981_v18 = vadd.f32 %v980_v15, %v979_v13 }
 0x15d   : > { %v982_v19 = vpop.f32.mrf.mxu0 }
 0x15e   : > { %v581_v20 = vpack.c.bf16 %v571_v17, %v570_v16  ;;  %v537_v22 = vadd.f32 %v981_v18, %v1544_v48 }
 0x15f   : > { %v983_v21 = vpop.f32.mrf.mxu0 }
 0x160   : > { %v984_v23 = vadd.f32 %v983_v21, %v982_v19  ;;  %1043 = vmatmul.mubr.bf16.gmra.mxu1 %v581_v20  ;;  %v572_v27 = vmax.f32 %v537_v22, 0.0 }
 0x161   : > { %v985_v24 = vpop.f32.mrf.mxu0  ;;  %1046 = vmatprep.mubr.msk.bf16.mxu1 %vm1332_vm0, %v1331_v0 }
 0x162   : > { %v540_v25 = vadd.f32 %v984_v23, %v1544_v48 }
 0x163   : > { %v986_v26 = vpop.f32.mrf.mxu0 }
 0x164   : > { %v573_v28 = vmax.f32 %v540_v25, 0.0  ;;  %v987_v29 = vadd.f32 %v986_v26, %v985_v24 }
 0x165   : > { %v988_v30 = vpop.f32.mrf.mxu0 }
 0x166   : > { %v582_v31 = vpack.c.bf16 %v573_v28, %v572_v27  ;;  %v545_v33 = vadd.f32 %v987_v29, %v1544_v48 }
 0x167   : > { %v989_v32 = vpop.f32.mrf.mxu0 }
 0x168   : > { %v990_v34 = vadd.f32 %v989_v32, %v988_v30  ;;  %1047 = vmatmul.mubr.bf16.gmra.mxu1 %v582_v31  ;;  %v574_v38 = vmax.f32 %v545_v33, 0.0 }
 0x169   : > { %v991_v35 = vpop.f32.mrf.mxu0  ;;  %1050 = vmatprep.mubr.msk.bf16.mxu1 %vm1332_vm0, %v1331_v0 }
 0x16a   : > { %v548_v36 = vadd.f32 %v990_v34, %v1544_v48 }
 0x16b   : > { %v992_v37 = vpop.f32.mrf.mxu0 }
 0x16c   : > { %v575_v39 = vmax.f32 %v548_v36, 0.0  ;;  %v993_v40 = vadd.f32 %v992_v37, %v991_v35 }
 0x16d   : > { %v994_v41 = vpop.f32.mrf.mxu0 }
 0x16e   : > { %v583_v42 = vpack.c.bf16 %v575_v39, %v574_v38  ;;  %v553_v45 = vadd.f32 %v993_v40, %v1544_v48 }
 0x16f   : > { %v995_v43 = vpop.f32.mrf.mxu0 }
 0x170   : > { %v996_v46 = vadd.f32 %v995_v43, %v994_v41  ;;  %1051 = vmatmul.mubr.bf16.gmra.mxu1 %v583_v42  ;;  %v576_v51 = vmax.f32 %v553_v45, 0.0 }
 0x171   : > { %v997_v47 = vpop.f32.mrf.mxu0  ;;  %1054 = vmatprep.mubr.msk.bf16.mxu1 %vm1332_vm0, %v1331_v0 }
 0x172   : > { %v556_v49 = vadd.f32 %v996_v46, %v1544_v48 }
 0x173   : > { %v998_v50 = vpop.f32.mrf.mxu0 }
 0x174   : > { %v577_v52 = vmax.f32 %v556_v49, 0.0  ;;  %v999_v53 = vadd.f32 %v998_v50, %v997_v47 }
 0x175   : > { %v1000_v54 = vpop.f32.mrf.mxu0 }
 0x176   : > { %v561_v55 = vadd.f32 %v999_v53, %v1544_v48  ;;  %v584_v56 = vpack.c.bf16 %v577_v52, %v576_v51 }
 0x177   : > { %v1001_v57 = vpop.f32.mrf.mxu0 }
 0x178   : > { %1055 = vmatmul.mubr.bf16.gmra.mxu1 %v584_v56  ;;  %v578_v58 = vmax.f32 %v561_v55, 0.0 }
 0x179   : > { %1058 = vmatprep.mubr.msk.bf16.mxu1 %vm1332_vm0, %v1331_v0 }
 0x17a   : > { %v585_v59 = vpack.c.bf16 %v578_v58, %v578_v58 }
 0x180   : > { %1059 = vmatmul.mubr.bf16.gmra.mxu1 %v585_v59 }
 0x210   : > { %v688_v60 = vpop.f32.mrf.mxu1 }
 0x211   : > { %v689_v61 = vadd.f32 %v688_v60, %v1542_v44 }
 0x212   : > { %v1036_v62 = vpop.f32.mrf.mxu1 }
 0x213   : > { %v742_v63 = vmax.f32 %v689_v61, 0.0 }
 0x214   : > { %v691_v1 = vpop.f32.mrf.mxu1 }
 0x215   : > { %755 = vst [vmem:[%s1574_s6] sm:$0xff] %v742_v63  ;;  %v692_v48 = vadd.f32 %v691_v1, %v1542_v44 }
 0x216   : > { %v1037_v0 = vpop.f32.mrf.mxu1 }
 0x217   : > { %v743_v2 = vmax.f32 %v692_v48, 0.0 }
 0x218   : > { %v696_v3 = vpop.f32.mrf.mxu1 }
 0x219   : > { %756 = vst [vmem:[%s1574_s6 + $0x8] sm:$0xff] %v743_v2  ;;  %v697_v4 = vadd.f32 %v696_v3, %v1542_v44 }
 0x21a   : > { %v1040_v5 = vpop.f32.mrf.mxu1 }
 0x21b   : > { %v744_v6 = vmax.f32 %v697_v4, 0.0 }
 0x21c   : > { %v699_v7 = vpop.f32.mrf.mxu1 }
 0x21d   : > { %757 = vst [vmem:[%s1574_s6 + $0x10] sm:$0xff] %v744_v6  ;;  %v700_v8 = vadd.f32 %v699_v7, %v1542_v44 }
 0x21e   : > { %v1041_v9 = vpop.f32.mrf.mxu1 }
 0x21f   : > { %v745_v10 = vmax.f32 %v700_v8, 0.0 }
 0x220   : > { %v704_v11 = vpop.f32.mrf.mxu1 }
 0x221   : > { %758 = vst [vmem:[%s1574_s6 + $0x18] sm:$0xff] %v745_v10  ;;  %v705_v12 = vadd.f32 %v704_v11, %v1542_v44 }
 0x222   : > { %v1044_v13 = vpop.f32.mrf.mxu1 }
 0x223   : > { %v746_v14 = vmax.f32 %v705_v12, 0.0 }
 0x224   : > { %v707_v15 = vpop.f32.mrf.mxu1 }
 0x225   : > { %759 = vst [vmem:[%s1574_s6 + $0x20] sm:$0xff] %v746_v14  ;;  %v708_v16 = vadd.f32 %v707_v15, %v1542_v44 }
 0x226   : > { %v1045_v17 = vpop.f32.mrf.mxu1 }
 0x227   : > { %v747_v18 = vmax.f32 %v708_v16, 0.0 }
 0x228   : > { %v712_v19 = vpop.f32.mrf.mxu1 }
 0x229   : > { %760 = vst [vmem:[%s1574_s6 + $0x28] sm:$0xff] %v747_v18  ;;  %v713_v20 = vadd.f32 %v712_v19, %v1542_v44 }
 0x22a   : > { %v1048_v21 = vpop.f32.mrf.mxu1 }
 0x22b   : > { %v748_v22 = vmax.f32 %v713_v20, 0.0 }
 0x22c   : > { %v715_v23 = vpop.f32.mrf.mxu1 }
 0x22d   : > { %761 = vst [vmem:[%s1574_s6 + $0x30] sm:$0xff] %v748_v22  ;;  %v716_v24 = vadd.f32 %v715_v23, %v1542_v44 }
 0x22e   : > { %v1049_v25 = vpop.f32.mrf.mxu1 }
 0x22f   : > { %v749_v26 = vmax.f32 %v716_v24, 0.0 }
 0x230   : > { %v720_v27 = vpop.f32.mrf.mxu1 }
 0x231   : > { %762 = vst [vmem:[%s1574_s6 + $0x38] sm:$0xff] %v749_v26  ;;  %v721_v28 = vadd.f32 %v720_v27, %v1542_v44 }
 0x232   : > { %v1052_v29 = vpop.f32.mrf.mxu1 }
 0x233   : > { %v750_v30 = vmax.f32 %v721_v28, 0.0 }
 0x234   : > { %v723_v31 = vpop.f32.mrf.mxu1 }
 0x235   : > { %763 = vst [vmem:[%s1574_s6 + $0x40] sm:$0xff] %v750_v30  ;;  %v724_v32 = vadd.f32 %v723_v31, %v1542_v44 }
 0x236   : > { %v1053_v33 = vpop.f32.mrf.mxu1 }
 0x237   : > { %v751_v34 = vmax.f32 %v724_v32, 0.0 }
 0x238   : > { %v728_v35 = vpop.f32.mrf.mxu1 }
 0x239   : > { %764 = vst [vmem:[%s1574_s6 + $0x48] sm:$0xff] %v751_v34  ;;  %v729_v36 = vadd.f32 %v728_v35, %v1542_v44 }
 0x23a   : > { %v1056_v37 = vpop.f32.mrf.mxu1 }
 0x23b   : > { %v752_v38 = vmax.f32 %v729_v36, 0.0 }
 0x23c   : > { %v731_v39 = vpop.f32.mrf.mxu1 }
 0x23d   : > { %765 = vst [vmem:[%s1574_s6 + $0x50] sm:$0xff] %v752_v38  ;;  %v732_v40 = vadd.f32 %v731_v39, %v1542_v44 }
 0x23e   : > { %v1057_v41 = vpop.f32.mrf.mxu1 }
 0x23f   : > { %v753_v42 = vmax.f32 %v732_v40, 0.0 }
 0x240   : > { %v736_v43 = vpop.f32.mrf.mxu1 }
 0x241   : > { %766 = vst [vmem:[%s1574_s6 + $0x58] sm:$0xff] %v753_v42  ;;  %v737_v45 = vadd.f32 %v736_v43, %v1542_v44 }
 0x242   : > { %v1060_v46 = vpop.f32.mrf.mxu1  ;;  %775 = sbr.rel (!%p1679_p10) target bundleno = 610 (0x262), region = 52 }
 0x243   : > { %v754_v47 = vmax.f32 %v737_v45, 0.0 }
 0x244   : > { %v739_v49 = vpop.f32.mrf.mxu1 }
 0x245   : > { %767 = vst [vmem:[%s1574_s6 + $0x60] sm:$0xff] %v754_v47 }
 0x246   : > { %v1061_v50 = vpop.f32.mrf.mxu1 }
 0x247   : > { %s1688_s14 = smov (!%p778_p1, %s777_s14), 13 }
 0x248   : > { %s1605_s7 = sshll.u32 %s1688_s14, 7 }
 0x249   : > { %s782_s8 = ssub.s32 1664, %s1605_s7 }
 0x24a   : > { %783 = vsyncadd %s769_s9, %s782_s8  ;;  %p934_p3 = scmp.ne.s32.totalorder %s1605_s7, 0  ;;  %s943_s27 = smul.u32 1664, %s1382_s19 }
 0x24b   : > { %s788_s10 = sshll.u32 %s1574_s6, 4  ;;  %s1333_s23 = smov [#allocation8]   ;;  %s1618_s10 = int_to_ptr.vmem [resolvable:$true] %s788_s10 }
 0x24c   : > { %s1616_s13 = scalar_lea.hbm %s1667_s4, %s943_s27  ;;  %s1254_s20 = scalar_lea.vmem %s1618_s10, %s1605_s7 }
 0x24d   : > { %p1255_p7 = scmp.ne.s32.totalorder %s1618_s10, %s1254_s20  ;;  %s1258_s30 = sshll.u32 %s1333_s23, 4  ;;  %s1259_s30 = int_to_ptr.vmem [resolvable:$false] %s1258_s30 }
 0x24e   : > { %s1260_s19 = scalar_lea.vmem %s1259_s30, 3328  ;;  %p1261_p4 = scmp.lt.s32.totalorder %s1618_s10, %s1259_s30 }
 0x24f   : > { %p1256_p9 = pnand %p1255_p7, %p934_p3  ;;  %p1262_p6 = scmp.lt.s32.totalorder %s1260_s19, %s1254_s20 }
 0x251   : > { %p1257_p12 = pneg %p1256_p9  ;;  %p1263_p11 = por %p1262_p6, %p1261_p4 }
 0x253   : > { %p1264_p0 = pnand %p1263_p11, %p1257_p12 }
 0x255   : > { %1267 = shalt.err (!%p1264_p0)
}
 0x256   : > { %s1268_s5 = scalar_lea.hbm %s1616_s13, %s1605_s7  ;;  %s1272_s6 = scalar_lea.hbm %s1667_s4, 3200 }
 0x257   : > { %p1269_p2 = scmp.ne.s32.totalorder %s1616_s13, %s1268_s5  ;;  %p1273_p10 = scmp.lt.s32.totalorder %s1616_s13, %s1667_s4 }
 0x258   : > { %p1274_p1 = scmp.lt.s32.totalorder %s1272_s6, %s1268_s5 }
 0x259   : > { %p1270_p5 = pnand %p1269_p2, %p934_p3 }
 0x25a   : > { %p1275_p7 = por %p1274_p1, %p1273_p10 }
 0x25b   : > { %p1271_p13 = pneg %p1270_p5 }
 0x25d   : > { %p1276_p9 = pnand %p1275_p7, %p1271_p13 }
 0x25f   : > { %1279 = shalt.err (!%p1276_p9)
}
 0x260   : > { %s1334_s8 = smov 128   ;;  %s1335_s27 = smov 8  }
 0x261   : > { %794 = dma.vmem_to_hbm [thread:$0]  (%p934_p3), %s1618_s10, %s1605_s7, %s1616_s13, %s769_s9, %s1334_s8, %s1334_s8, %s1335_s27  }
 0x262 PF: > { %s803_s25 = sand.u32 1, %s1310_s15   ;;  %p1680_p12 = scmp.ne.s32.totalorder %s1673_s28, 0 }
 0x263   : > { %s804_s12 = scalar_lea.sflag [#allocation4], %s803_s25 }
 0x264   : > { %p1082_p4 = pnand %p884_p8, %p1680_p12 }
 0x266   : > { %p1083_p6 = pneg %p1082_p4 }
 0x268   : > { %1305 = dma.done.wait (%p1083_p6), %s804_s12, 1664  }
 0x269   : > { %1307 = vsyncadd (%p1083_p6), %s804_s12, 4294965632  ;;  %p18_p11 = scmp.ge.s32.totalorder %s1386_s21, 4   ;;  %s1681_s15 = smov %s1314_s16 }
 0x26a   : > { %s1682_s16 = smov %s1318_s17  ;;  %s1683_s17 = smov %s1398_s24 }
 0x26b   : > { %s1684_s18 = smov %s1386_s21  ;;  %20 = sbr.rel (!%p18_p11) target bundleno = 6 (0x6), region = 89 }
 0x270   :  { %809 = vsyncpa [#allocation3], 1 }
 0x271   :  { %811 = vsyncpa [#allocation3 + $0x1], 1 }
 0x272   :  { %812 = vsyncpa [#allocation6], 1 }
 0x273   :  { %813 = vsyncpa [#allocation4], 1 }
 0x274   :  { %815 = vsyncpa [#allocation4 + $0x1], 1 }

</bundles_post_ra>
